<compile_context>
chip_gen: v5e
topology: v5e:2x2
jax: 0.10.0
libtpu: 0.0.40
codegen_flags: <defaults>
</compile_context>

<pallas_src>
import jax
import jax.numpy as jnp
from jax.experimental import pallas as pl
from jax.experimental.pallas import tpu as pltpu

_LANE = 128  # lane width of a vreg


def _odefunc_kernel(y_ref, p_ref, o_ref):
    # y_ref : (2, TB)  feature-major batch tile (batch on lanes)
    # p_ref : (50, 8)  packed params:
    #           col 0,1 = w1[:,0], w1[:,1]   (Linear(2,50) weight, torch layout)
    #           col 2   = b1
    #           col 3,4 = w2[0,:], w2[1,:]   (Linear(50,2) weight rows)
    #           col 5   = b2 in rows 0..1
    # o_ref : (2, TB)
    y = y_ref[...]
    y3 = y * y * y                                              # (2, TB) cube on VPU

    w1c0 = p_ref[:, 0:1]                                        # (50, 1)
    w1c1 = p_ref[:, 1:2]
    b1 = p_ref[:, 2:3]
    w2c0 = p_ref[:, 3:4]
    w2c1 = p_ref[:, 4:5]

    # Layer 1 (Linear(2->50)): K=2 contraction as two broadcast FMAs + EUP tanh.
    h = jnp.tanh(w1c0 * y3[0:1, :] + w1c1 * y3[1:2, :] + b1)    # (50, TB)

    # Layer 2 (Linear(50->2)): N=2 as two VPU multiplies + XLU sublane reduces,
    # written straight into the output rows (no concatenated temporary).
    o0 = jnp.sum(w2c0 * h, axis=0, keepdims=True)               # (1, TB)
    o1 = jnp.sum(w2c1 * h, axis=0, keepdims=True)               # (1, TB)
    o_ref[0:1, :] = (o0 + p_ref[0:1, 5:6]).astype(o_ref.dtype)
    o_ref[1:2, :] = (o1 + p_ref[1:2, 5:6]).astype(o_ref.dtype)


def prepare_params(w1, b1, w2, b2):
    """Pack all parameters into one (50, 8) f32 block. Call ONCE, outside the
    ODE solver loop.

    w1: (50, 2) PyTorch weight of Linear(2, 50)
    b1: (50,)
    w2: (2, 50) PyTorch weight of Linear(50, 2)
    b2: (2,)
    """
    p = jnp.zeros((50, 8), jnp.float32)
    p = p.at[:, 0:2].set(jnp.asarray(w1, jnp.float32))
    p = p.at[:, 2].set(jnp.asarray(b1, jnp.float32))
    p = p.at[:, 3:5].set(jnp.asarray(w2, jnp.float32).T)
    p = p.at[0:2, 5].set(jnp.asarray(b2, jnp.float32))
    return p


def _pick_block_b(pad_b, max_block_b):
    """Largest lane-multiple tile that divides pad_b, is <= max_block_b, and
    (when possible) leaves >= 2 grid steps so v7x's two TCs both engage."""
    m = pad_b // _LANE
    cap = max(1, min(max_block_b // _LANE, m if m < 2 else m // 2))
    d = cap
    while m % d != 0:
        d -= 1
    return d * _LANE


def odefunc_forward_fm(t, y_fm, params, *, max_block_b=8192):
    """Feature-major forward: y_fm is (2, pad_b) with pad_b % 128 == 0.

    This is the form to use inside a solver loop (no per-call transposes/pads).
    Padded lanes produce harmless garbage; keep them padded across the solve.
    """
    del t  # unused, as in the reference module
    two, pad_b = y_fm.shape
    assert two == 2 and pad_b % _LANE == 0, "y_fm must be (2, k*128)"
    block_b = _pick_block_b(pad_b, max_block_b)

    return pl.pallas_call(
        _odefunc_kernel,
        out_shape=jax.ShapeDtypeStruct((2, pad_b), jnp.float32),
        grid=(pad_b // block_b,),
        in_specs=[
            pl.BlockSpec((2, block_b), lambda i: (0, i)),   # y^T batch tile
            pl.BlockSpec((50, 8), lambda i: (0, 0)),        # packed params
        ],
        out_specs=pl.BlockSpec((2, block_b), lambda i: (0, i)),
        compiler_params=pltpu.CompilerParams(
            dimension_semantics=("parallel",)),             # splits across v7x TCs
    )(y_fm.astype(jnp.float32), params)


def odefunc_forward(t, y, params, *, max_block_b=8192):
    """(batch, feature) convenience wrapper around odefunc_forward_fm.

    t      : scalar (ignored, kept for API parity with the PyTorch module)
    y      : (B, 2) float32
    params : output of prepare_params(w1, b1, w2, b2)
    """
    B = y.shape[0]
    pad128 = max(_LANE, -(-B // _LANE) * _LANE)
    if pad128 >= 2 * _LANE:
        block_b = min(max_block_b, -(-(pad128 // 2) // _LANE) * _LANE)
    else:
        block_b = pad128
    pad_b = -(-pad128 // block_b) * block_b

    y_fm = jnp.pad(y.T.astype(jnp.float32), ((0, 0), (0, pad_b - B)))
    out_fm = odefunc_forward_fm(t, y_fm, params, max_block_b=max_block_b)
    return out_fm[:, :B].T


def _reference_forward(t, y, w1, b1, w2, b2):
    # Pure-JAX reference matching the PyTorch semantics exactly.
    del t
    h = jnp.tanh((y ** 3) @ w1.T + b1)
    return h @ w2.T + b2


if __name__ == "__main__":
    key = jax.random.PRNGKey(0)
    k_y, k_w1, k_w2 = jax.random.split(key, 3)

    B = 8
    y = jax.random.normal(k_y, (B, 2), dtype=jnp.float32)
    t = jnp.float32(0.0)

    # Deterministic init mirroring ODEFunc.__init__:
    #   nn.init.normal_(weight, mean=0, std=0.1); nn.init.constant_(bias, 0)
    w1 = 0.1 * jax.random.normal(k_w1, (50, 2), dtype=jnp.float32)
    b1 = jnp.zeros((50,), dtype=jnp.float32)
    w2 = 0.1 * jax.random.normal(k_w2, (2, 50), dtype=jnp.float32)
    b2 = jnp.zeros((2,), dtype=jnp.float32)

    params = prepare_params(w1, b1, w2, b2)   # once, outside the solver loop
    ref = _reference_forward(t, y, w1, b1, w2, b2)

    # (batch, feature) wrapper path.
    out = jax.block_until_ready(odefunc_forward(t, y, params))
    assert out.shape == (B, 2) and out.dtype == jnp.float32
    assert jnp.allclose(out, ref, atol=1e-5, rtol=1e-5), "mismatch (wrapper)"

    # Feature-major path (what a solver loop should use; pad once, slice once).
    pad_b = 128
    y_fm = jnp.pad(y.T.astype(jnp.float32), ((0, 0), (0, pad_b - B)))
    out_fm = jax.block_until_ready(odefunc_forward_fm(t, y_fm, params))
    assert out_fm.shape == (2, pad_b)
    assert jnp.allclose(out_fm[:, :B].T, ref, atol=1e-5, rtol=1e-5), "mismatch (fm)"

    # A larger batch exercises the multi-step grid (>=2 steps -> both v7x TCs).
    B2 = 1000
    y2 = jax.random.normal(jax.random.PRNGKey(1), (B2, 2), dtype=jnp.float32)
    out2 = jax.block_until_ready(odefunc_forward(t, y2, params))
    ref2 = _reference_forward(t, y2, w1, b1, w2, b2)
    assert jnp.allclose(out2, ref2, atol=1e-5, rtol=1e-5), "mismatch (large B)"

    print("KERNEL_OK")
</pallas_src>

<mosaic_0001>
module attributes {stable_mosaic.version = 11 : i64} {
  func.func @_odefunc_kernel(%arg0: i32, %arg1: memref<2x128xf32, #tpu.memory_space<vmem>>, %arg2: memref<50x8xf32, #tpu.memory_space<vmem>>, %arg3: memref<2x128xf32, #tpu.memory_space<vmem>>) attributes {dimension_semantics = [#tpu.dimension_semantics<parallel>], iteration_bounds = array<i64: 1>, scalar_prefetch = 0 : i64, scratch_operands = 0 : i64, tpu.core_type = #tpu.core_type<tc>, window_params = [{transform_indices = @transform_0, window_bounds = array<i64: 2, 128>}, {pipeline_mode = #tpu.pipeline_mode<synchronous>, transform_indices = @transform_1, window_bounds = array<i64: 50, 8>}, {transform_indices = @transform_2, window_bounds = array<i64: 2, 128>}]} {
    %c0 = arith.constant 0 : index
    %c0_0 = arith.constant 0 : index
    %0 = vector.load %arg1[%c0, %c0_0] : memref<2x128xf32, #tpu.memory_space<vmem>>, vector<2x128xf32>
    %1 = arith.mulf %0, %0 : vector<2x128xf32>
    %2 = arith.mulf %1, %0 : vector<2x128xf32>
    %c0_1 = arith.constant 0 : index
    %c0_2 = arith.constant 0 : index
    %3 = vector.load %arg2[%c0_1, %c0_2] : memref<50x8xf32, #tpu.memory_space<vmem>>, vector<50x1xf32>
    %c0_3 = arith.constant 0 : index
    %c1 = arith.constant 1 : index
    %4 = vector.load %arg2[%c0_3, %c1] : memref<50x8xf32, #tpu.memory_space<vmem>>, vector<50x1xf32>
    %c0_4 = arith.constant 0 : index
    %c2 = arith.constant 2 : index
    %5 = vector.load %arg2[%c0_4, %c2] : memref<50x8xf32, #tpu.memory_space<vmem>>, vector<50x1xf32>
    %c0_5 = arith.constant 0 : index
    %c3 = arith.constant 3 : index
    %6 = vector.load %arg2[%c0_5, %c3] : memref<50x8xf32, #tpu.memory_space<vmem>>, vector<50x1xf32>
    %c0_6 = arith.constant 0 : index
    %c4 = arith.constant 4 : index
    %7 = vector.load %arg2[%c0_6, %c4] : memref<50x8xf32, #tpu.memory_space<vmem>>, vector<50x1xf32>
    %8 = vector.extract_strided_slice %2 {offsets = [0, 0], sizes = [1, 128], strides = [1, 1]} : vector<2x128xf32> to vector<1x128xf32>
    %9 = vector.broadcast %3 : vector<50x1xf32> to vector<50x128xf32>
    %10 = vector.broadcast %8 : vector<1x128xf32> to vector<50x128xf32>
    %11 = arith.mulf %9, %10 : vector<50x128xf32>
    %12 = vector.extract_strided_slice %2 {offsets = [1, 0], sizes = [1, 128], strides = [1, 1]} : vector<2x128xf32> to vector<1x128xf32>
    %13 = vector.broadcast %4 : vector<50x1xf32> to vector<50x128xf32>
    %14 = vector.broadcast %12 : vector<1x128xf32> to vector<50x128xf32>
    %15 = arith.mulf %13, %14 : vector<50x128xf32>
    %16 = arith.addf %11, %15 : vector<50x128xf32>
    %17 = vector.broadcast %5 : vector<50x1xf32> to vector<50x128xf32>
    %18 = arith.addf %16, %17 : vector<50x128xf32>
    %19 = math.tanh %18 : vector<50x128xf32>
    %20 = vector.broadcast %6 : vector<50x1xf32> to vector<50x128xf32>
    %21 = arith.mulf %20, %19 : vector<50x128xf32>
    %cst = arith.constant dense<0.000000e+00> : vector<128xf32>
    %22 = vector.multi_reduction <add>, %21, %cst [0] : vector<50x128xf32> to vector<128xf32>
    %23 = vector.shape_cast %22 : vector<128xf32> to vector<1x128xf32>
    %24 = vector.broadcast %7 : vector<50x1xf32> to vector<50x128xf32>
    %25 = arith.mulf %24, %19 : vector<50x128xf32>
    %cst_7 = arith.constant dense<0.000000e+00> : vector<128xf32>
    %26 = vector.multi_reduction <add>, %25, %cst_7 [0] : vector<50x128xf32> to vector<128xf32>
    %27 = vector.shape_cast %26 : vector<128xf32> to vector<1x128xf32>
    %c0_8 = arith.constant 0 : index
    %c5 = arith.constant 5 : index
    %28 = vector.load %arg2[%c0_8, %c5] : memref<50x8xf32, #tpu.memory_space<vmem>>, vector<1x1xf32>
    %29 = vector.broadcast %28 : vector<1x1xf32> to vector<1x128xf32>
    %30 = arith.addf %23, %29 : vector<1x128xf32>
    %c0_9 = arith.constant 0 : index
    %c0_10 = arith.constant 0 : index
    %31 = vector.load %arg3[%c0_9, %c0_10] : memref<2x128xf32, #tpu.memory_space<vmem>>, vector<1x128xf32>
    tpu.vector_store %arg3[%c0_9, %c0_10], %30 {strides = array<i32>} : memref<2x128xf32, #tpu.memory_space<vmem>>, vector<1x128xf32>,
    %c1_11 = arith.constant 1 : index
    %c5_12 = arith.constant 5 : index
    %32 = vector.load %arg2[%c1_11, %c5_12] : memref<50x8xf32, #tpu.memory_space<vmem>>, vector<1x1xf32>
    %33 = vector.broadcast %32 : vector<1x1xf32> to vector<1x128xf32>
    %34 = arith.addf %27, %33 : vector<1x128xf32>
    %c1_13 = arith.constant 1 : index
    %c0_14 = arith.constant 0 : index
    %35 = vector.load %arg3[%c1_13, %c0_14] : memref<2x128xf32, #tpu.memory_space<vmem>>, vector<1x128xf32>
    tpu.vector_store %arg3[%c1_13, %c0_14], %34 {strides = array<i32>} : memref<2x128xf32, #tpu.memory_space<vmem>>, vector<1x128xf32>,
    return
  }
  func.func @transform_0(%arg0: i32) -> (i32, i32) {
    %c0_i32 = arith.constant 0 : i32
    %c0_i32_0 = arith.constant 0 : i32
    return %c0_i32, %arg0 : i32, i32
  }
  func.func @transform_1(%arg0: i32) -> (i32, i32) {
    %c0_i32 = arith.constant 0 : i32
    %c0_i32_0 = arith.constant 0 : i32
    %c0_i32_1 = arith.constant 0 : i32
    return %c0_i32, %c0_i32_0 : i32, i32
  }
  func.func @transform_2(%arg0: i32) -> (i32, i32) {
    %c0_i32 = arith.constant 0 : i32
    %c0_i32_0 = arith.constant 0 : i32
    return %c0_i32, %arg0 : i32, i32
  }
}

</mosaic_0001>

<bundles_post_ra>
// kernel: tpu_custom_call.1
= control target key start
LH: loop header
LB: loop body
LE: loop exit
PB: predicated region body
PF: predicated region fallthrough
CT: control target
= control target key end

     0   :  { %v346_v3 = vmov 0   ;;  %s414_s0 = inlined_call_operand.vmem [shape: f32[2,128], index: 0, kind: input, shape index: {}]   ;;  %s415_s1 = inlined_call_operand.vmem [shape: f32[50,8], index: 1, kind: input, shape index: {}]   ;;  %s416_s2 = inlined_call_operand.hbm [shape: f32[2,128], index: 2, kind: output, shape index: {}]  }
   0x1   :  { %v371_v0 = vld [vmem:[%s415_s1 + $0x20] sm:$0xff]  ;;  %v17_v1 = vld [vmem:[%s415_s1 + $0x10] sm:$0xff]  ;;  %288 = vset.pattern.permute.xlu2 %v346_v3  ;;  %287 = vset.pattern.permute.xlu1 %v346_v3 }
   0x2   :  { %v15_v2 = vld [vmem:[%s415_s1] sm:$0xff]  ;;  %286 = vset.pattern.permute.xlu0 %v346_v3  ;;  %44 = vperm.xlu2 %288, %v371_v0  }
   0x3   :  { %7 = vsyncpa [#allocation3], 0  ;;  %34 = vperm.xlu1 %287, %v17_v1   ;;  %24 = vperm.xlu0 %286, %v15_v2   ;;  %v20_v4 = vld [vmem:[%s415_s1 + $0x28] sm:$0xff]  ;;  %v18_v5 = vld [vmem:[%s415_s1 + $0x18] sm:$0xff]  ;;  %v347_v8 = vmov 1   ;;  %v348_v9 = vmov 2  }
   0x4   :  { %v16_v6 = vld [vmem:[%s415_s1 + $0x8] sm:$0xff]  ;;  %v21_v7 = vld [vmem:[%s415_s1 + $0x30] sm:$0x3]  ;;  %v349_v10 = vmov 3   ;;  %v350_v11 = vmov 4   ;;  %v351_v12 = vmov 5  }
   0x5   :  { %v247_v13 = vld [vmem:[%s415_s1] sm:$0x1]  ;;  %v255_v17 = vld [vmem:[%s415_s1 + $0x1] sm:$0x1]  ;;  %vm190_vm0 = vcmask 1041408   ;;  %s270_s3 = sshll.u32 %s416_s2, 4  ;;  %s271_s3 = int_to_ptr.hbm [resolvable:$true] %s270_s3 }
   0x6   :  { %v12_v30 = vld [vmem:[%s414_s0] sm:$0x3]  ;;  %s352_s0 = smov [#allocation2]  }
   0x7   :  { %v13_v32 = vmul.f32 %v12_v30, %v12_v30  ;;  %s268_s1 = sshll.u32 %s352_s0, 4  ;;  %s269_s1 = int_to_ptr.vmem [resolvable:$true] %s268_s1 }
   0x9   :  { %v14_v34 = vmul.f32 %v13_v32, %v12_v30 }
   0xa   :  { %49 = vperm.xlu2 %288, %v20_v4  }
   0xb   :  { %39 = vperm.xlu1 %287, %v18_v5   ;;  %29 = vperm.xlu0 %286, %v16_v6   ;;  %v57_v37 = vperm.slane %v14_v34, 0  ;;  %v93_v38 = vperm.slane %v14_v34, 1 }
  0x12   :  { %290 = vset.pattern.permute.xlu2 %v347_v8 }
  0x13   :  { %289 = vset.pattern.permute.xlu1 %v347_v8  ;;  %54 = vperm.xlu0 %286, %v21_v7  }
  0x14   :  { %70 = vperm.xlu2 %290, %v16_v6   ;;  %66 = vperm.xlu1 %289, %v15_v2  }
  0x1b   :  { %291 = vset.pattern.permute.xlu0 %v347_v8 }
  0x1c   :  { %82 = vperm.xlu2 %290, %v371_v0   ;;  %78 = vperm.xlu1 %289, %v18_v5  }
  0x1d   :  { %74 = vperm.xlu0 %291, %v17_v1  }
  0x24   :  { %90 = vperm.xlu2 %290, %v21_v7   ;;  %86 = vperm.xlu1 %289, %v20_v4  }
  0x25   :  { %292 = vset.pattern.permute.xlu0 %v348_v9 }
  0x26   :  { %109 = vperm.xlu0 %292, %v15_v2  }
  0x2c   :  { %294 = vset.pattern.permute.xlu2 %v348_v9  ;;  %293 = vset.pattern.permute.xlu1 %v348_v9 }
  0x2d   :  { %117 = vperm.xlu2 %294, %v17_v1   ;;  %113 = vperm.xlu1 %293, %v16_v6  }
  0x2e   :  { %129 = vperm.xlu0 %292, %v20_v4  }
  0x35   :  { %125 = vperm.xlu2 %294, %v371_v0   ;;  %121 = vperm.xlu1 %293, %v18_v5  }
  0x36   :  { %296 = vset.pattern.permute.xlu0 %v349_v10 }
  0x37   :  { %155 = vperm.xlu0 %296, %v16_v6  }
  0x3d   :  { %295 = vset.pattern.permute.xlu2 %v349_v10  ;;  %133 = vperm.xlu1 %293, %v21_v7  }
  0x3e   :  { %151 = vperm.xlu2 %295, %v15_v2  }
  0x3f   :  { %299 = vset.pattern.permute.xlu0 %v350_v11 }
  0x40   :  { %204 = vperm.xlu0 %299, %v16_v6  }
  0x45   :  { %297 = vset.pattern.permute.xlu1 %v349_v10 }
  0x46   :  { %163 = vperm.xlu2 %295, %v18_v5   ;;  %159 = vperm.xlu1 %297, %v17_v1  }
  0x48   :  { %220 = vperm.xlu0 %299, %v20_v4  }
  0x4e   :  { %298 = vset.pattern.permute.xlu2 %v350_v11  ;;  %167 = vperm.xlu1 %297, %v371_v0  }
  0x4f   :  { %200 = vperm.xlu2 %298, %v15_v2  }
  0x50   :  { %304 = vset.pattern.permute.xlu0 %v351_v12 }
  0x51   :  { %250 = vperm.xlu0 %304, %v247_v13  }
  0x56   :  { %300 = vset.pattern.permute.xlu1 %v350_v11 }
  0x57   :  { %212 = vperm.xlu2 %298, %v18_v5   ;;  %208 = vperm.xlu1 %300, %v17_v1  }
  0x5c   :  { %v45_v14 = vpop.permute.xlu2 %44 }
  0x5d   :  { %v62_v62 = vmul.f32 %v57_v37, %v45_v14 }
  0x5f   :  { %301 = vset.pattern.permute.xlu2 %v349_v10  ;;  %216 = vperm.xlu1 %300, %v371_v0  }
  0x60   :  { %171 = vperm.xlu2 %301, %v20_v4  }
  0x64   :  { %v50_v15 = vpop.permute.xlu2 %49 }
  0x65   :  { %v63_v2 = vmul.f32 %v57_v37, %v50_v15 }
  0x67   :  { %302 = vset.pattern.permute.xlu1 %v349_v10 }
  0x68   :  { %303 = vset.pattern.permute.xlu2 %v350_v11  ;;  %175 = vperm.xlu1 %302, %v21_v7  }
  0x69   :  { %224 = vperm.xlu2 %303, %v21_v7  }
  0x6e   :  { %v71_v16 = vpop.permute.xlu2 %70 }
  0x6f   :  { %v95_v39 = vmul.f32 %v93_v38, %v71_v16 }
  0x70   :  { %305 = vset.pattern.permute.xlu1 %v351_v12 }
  0x71   :  { %258 = vperm.xlu1 %305, %v255_v17  }
  0x75   :  { %v35_v18 = vpop.permute.xlu1 %34  ;;  %v25_v19 = vpop.permute.xlu0 %24 }
  0x76   :  { %v83_v20 = vpop.permute.xlu2 %82  ;;  %v58_v42 = vmul.f32 %v57_v37, %v25_v19  ;;  %v60_v46 = vmul.f32 %v57_v37, %v35_v18 }
  0x77   :  { %v98_v60 = vmul.f32 %v93_v38, %v83_v20 }
  0x79   :  { %v105_v3 = vadd.f32 %v98_v60, %v62_v62 }
  0x7d   :  { %v40_v21 = vpop.permute.xlu1 %39  ;;  %v30_v23 = vpop.permute.xlu0 %29 }
  0x7e   :  { %v402_v22 = vpop.permute.xlu2 %90  ;;  %v59_v40 = vmul.f32 %v57_v37, %v30_v23  ;;  %v61_v53 = vmul.f32 %v57_v37, %v40_v21 }
  0x80   :  { %v102_v45 = vadd.f32 %v95_v39, %v59_v40 }
  0x85   :  { %v404_v26 = vpop.permute.xlu0 %54 }
  0x86   :  { %v67_v24 = vpop.permute.xlu1 %66 }
  0x87   :  { %v118_v25 = vpop.permute.xlu2 %117  ;;  %v94_v43 = vmul.f32 %v93_v38, %v67_v24  ;;  %v100_v24 = vmul.f32 %v93_v38, %v402_v22 }
  0x89   :  { %v101_v49 = vadd.f32 %v94_v43, %v58_v42 }
  0x8e   :  { %v79_v27 = vpop.permute.xlu1 %78 }
  0x8f   :  { %v126_v28 = vpop.permute.xlu2 %125  ;;  %v75_v29 = vpop.permute.xlu0 %74  ;;  %v97_v48 = vmul.f32 %v93_v38, %v79_v27 }
  0x90   :  { %v96_v44 = vmul.f32 %v93_v38, %v75_v29  ;;  %v140_v5 = vadd.f32 %v126_v28, %v105_v3 }
  0x91   :  { %v104_v55 = vadd.f32 %v97_v48, %v61_v53 }
  0x92   :  { %v103_v52 = vadd.f32 %v96_v44, %v60_v46 }
  0x94   :  { %v138_v57 = vadd.f32 %v118_v25, %v103_v52  ;;  %v64_v25 = vmul.f32 %v57_v37, %v404_v26 }
  0x96   :  { %v87_v31 = vpop.permute.xlu1 %86 }
  0x97   :  { %v99_v63 = vmul.f32 %v93_v38, %v87_v31  ;;  %v107_v31 = vadd.f32 %v100_v24, %v64_v25 }
  0x98   :  { %v152_v33 = vpop.permute.xlu2 %151  ;;  %v110_v35 = vpop.permute.xlu0 %109 }
  0x99   :  { %v136_v54 = vadd.f32 %v110_v35, %v101_v49  ;;  %v106_v6 = vadd.f32 %v99_v63, %v63_v2 }
  0x9f   :  { %v114_v36 = vpop.permute.xlu1 %113 }
  0xa0   :  { %v164_v41 = vpop.permute.xlu2 %163  ;;  %v137_v50 = vadd.f32 %v114_v36, %v102_v45  ;;  %v130_v51 = vpop.permute.xlu0 %129 }
  0xa1   :  { %v141_v11 = vadd.f32 %v130_v51, %v106_v6 }
  0xa2   :  { %306 = vtanh.f32 %v137_v50 }
  0xa3   :  { %308 = vtanh.f32 %v136_v54 }
  0xa4   :  { %310 = vtanh.f32 %v138_v57 }
  0xa7   :  { %v122_v47 = vpop.permute.xlu1 %121 }
  0xa8   :  { %v139_v58 = vadd.f32 %v122_v47, %v104_v55  ;;  %v307_v61 = vpop.eup %306 }
  0xa9   :  { %v201_v56 = vpop.permute.xlu2 %200  ;;  %v156_v0 = vpop.permute.xlu0 %155 }
  0xaa   :  { %312 = vtanh.f32 %v139_v58  ;;  %v309_v1 = vpop.eup %308  ;;  %v179_v4 = vmul.f32 %v307_v61, %v156_v0 }
  0xab   :  { %v311_v8 = vpop.eup %310  ;;  %v178_v9 = vmul.f32 %v309_v1, %v152_v33  ;;  %314 = vtanh.f32 %v140_v5  ;;  %v227_v33 = vmul.f32 %v309_v1, %v201_v56 }
  0xac   :  { %316 = vtanh.f32 %v141_v11 }
  0xad   :  { %v185_v13 = vadd.f32 %v179_v4, %v178_v9 }
  0xaf   :  { %v134_v59 = vpop.permute.xlu1 %133 }
  0xb0   :  { %v313_v10 = vpop.eup %312  ;;  %v142_v34 = vadd.f32 %v134_v59, %v107_v31 }
  0xb1   :  { %v213_v7 = vpop.permute.xlu2 %212  ;;  %v181_v14 = vmul.f32 %v313_v10, %v164_v41  ;;  %v315_v19 = vpop.eup %314 }
  0xb2   :  { %v317_v23 = vpop.eup %316  ;;  %v205_v27 = vpop.permute.xlu0 %204  ;;  %318 = vtanh.f32 %v142_v34  ;;  %v230_v40 = vmul.f32 %v313_v10, %v213_v7 }
  0xb3   :  { %v228_v32 = vmul.f32 %v307_v61, %v205_v27 }
  0xb5   :  { %v234_v36 = vadd.f32 %v228_v32, %v227_v33 }
  0xb8   :  { %v160_v12 = vpop.permute.xlu1 %159  ;;  %v319_v38 = vpop.eup %318 }
  0xb9   :  { %v180_v16 = vmul.f32 %v311_v8, %v160_v12 }
  0xba   :  { %v172_v20 = vpop.permute.xlu2 %171  ;;  %v221_v44 = vpop.permute.xlu0 %220 }
  0xbb   :  { %v186_v17 = vadd.f32 %v185_v13, %v180_v16  ;;  %v183_v28 = vmul.f32 %v317_v23, %v172_v20  ;;  %v232_v45 = vmul.f32 %v317_v23, %v221_v44 }
  0xbd   :  { %v187_v18 = vadd.f32 %v186_v17, %v181_v14 }
  0xc0   :  { %v168_v15 = vpop.permute.xlu1 %167 }
  0xc1   :  { %v182_v21 = vmul.f32 %v315_v19, %v168_v15 }
  0xc3   :  { %v188_v29 = vadd.f32 %v187_v18, %v182_v21  ;;  %v225_v43 = vpop.permute.xlu2 %224  ;;  %v251_v3 = vpop.permute.xlu0 %250 }
  0xc4   :  { %v233_v37 = vmul.f32 %v319_v38, %v225_v43 }
  0xc5   :  { %v189_v30 = vadd.f32 %v188_v29, %v183_v28 }
  0xc6   :  { %v239_v48 = vsel %vm190_vm0, %v233_v37, 0.0 }
  0xc9   :  { %v209_v35 = vpop.permute.xlu1 %208 }
  0xca   :  { %v229_v39 = vmul.f32 %v311_v8, %v209_v35 }
  0xcc   :  { %v235_v41 = vadd.f32 %v234_v36, %v229_v39 }
  0xce   :  { %v236_v42 = vadd.f32 %v235_v41, %v230_v40 }
  0xd1   :  { %v217_v22 = vpop.permute.xlu1 %216 }
  0xd2   :  { %v231_v26 = vmul.f32 %v315_v19, %v217_v22 }
  0xd4   :  { %v237_v46 = vadd.f32 %v236_v42, %v231_v26 }
  0xd6   :  { %v238_v47 = vadd.f32 %v237_v46, %v232_v45 }
  0xd8   :  { %v240_v49 = vadd.f32 %v239_v48, %v238_v47 }
  0xda   :  { %v176_v50 = vpop.permute.xlu1 %175  ;;  %v241_v51 = vrot.slane %v240_v49, 4 }
  0xdb   :  { %v184_v52 = vmul.f32 %v319_v38, %v176_v50 }
  0xdc   :  { %v242_v53 = vadd.f32 %v241_v51, %v240_v49 }
  0xdd   :  { %v191_v54 = vsel %vm190_vm0, %v184_v52, 0.0 }
  0xde   :  { %v192_v55 = vadd.f32 %v191_v54, %v189_v30  ;;  %v243_v56 = vrot.slane %v242_v53, 2 }
  0xe0   :  { %v193_v57 = vrot.slane %v192_v55, 4  ;;  %v244_v58 = vadd.f32 %v243_v56, %v242_v53 }
  0xe2   :  { %v194_v59 = vadd.f32 %v193_v57, %v192_v55  ;;  %v245_v60 = vrot.slane %v244_v58, 1 }
  0xe3   :  { %v259_v61 = vpop.permute.xlu1 %258 }
  0xe4   :  { %v246_v62 = vadd.f32 %v245_v60, %v244_v58  ;;  %v195_v63 = vrot.slane %v194_v59, 2 }
  0xe6   :  { %v261_v0 = vadd.f32 %v259_v61, %v246_v62  ;;  %v196_v1 = vadd.f32 %v195_v63, %v194_v59 }
  0xe8   :  { %262 = vst [vmem:[#allocation2 + $0x1] sm:$0x1] %v261_v0  ;;  %v197_v2 = vrot.slane %v196_v1, 1 }
  0xea   :  { %v198_v4 = vadd.f32 %v197_v2, %v196_v1 }
  0xec   :  { %v253_v5 = vadd.f32 %v251_v3, %v198_v4 }
  0xee   :  { %254 = vst [vmem:[#allocation2] sm:$0x1] %v253_v5 }
  0xef   :  { %273 = dma.vmem_to_hbm [thread:$0]  %s269_s1, 32, %s271_s3, [#allocation3]  }
  0xf0   :  { %344 = dma.done.wait [#allocation3], 32  }
  0xf1   :  { %345 = vsyncadd [#allocation3], 4294967264 }
  0xf2   :  { %278 = vsyncpa [#allocation3], 1 }

</bundles_post_ra>
